<compile_context>
chip_gen: v6e
topology: v6e:2x2x1
jax: 0.10.0
libtpu: 0.0.40
codegen_flags: <defaults>
</compile_context>

<pallas_src>
import functools

import jax
import jax.numpy as jnp
from jax.experimental import pallas as pl
from jax.experimental.pallas import tpu as pltpu


def _se_kernel(x_ref, w1t_ref, b1_ref, w2t_ref, b2_ref, o_ref, *, inv_hw):
    """x_ref: (B_TILE, C, HW_pad).  w1t: (C, S), b1: (1, S), w2t: (S, C), b2: (1, C)."""
    x = x_ref[...]                                              # (BT, C, HWp)
    xf = x if x.dtype == jnp.float32 else x.astype(jnp.float32)

    # AdaptiveAvgPool2d((1,1)): spatial mean.  Padded columns are zero, so the
    # sum over the padded axis divided by the *real* HW is the exact mean.
    pooled = jnp.sum(xf, axis=-1) * inv_hw                      # (BT, C)

    # se1 (1x1 conv) + ReLU: batched matmul instead of per-sample matvec.
    h = jnp.dot(pooled, w1t_ref[...],
                preferred_element_type=jnp.float32) + b1_ref[...]   # (BT, S)
    h = jnp.maximum(h, 0.0)

    # se2 (1x1 conv) + sigmoid.
    g = jnp.dot(h, w2t_ref[...],
                preferred_element_type=jnp.float32) + b2_ref[...]   # (BT, C)
    g = jax.nn.sigmoid(g)

    # Gate: broadcast per-(batch, channel) scale over the spatial (lane) axis.
    o_ref[...] = (xf * g[:, :, None]).astype(o_ref.dtype)


def _pick_batch_tile(n, per_elem_bytes, vmem_budget_bytes):
    """Largest divisor of n whose double-buffered in+out block fits the budget."""
    # 2 pipeline buffers x (input + output) x block_bytes <= budget
    max_block_bytes = max(per_elem_bytes, vmem_budget_bytes // 4)
    max_bt = max(1, min(n, max_block_bytes // max(per_elem_bytes, 1)))
    bt = 1
    for d in range(1, n + 1):
        if n % d == 0 and d <= max_bt:
            bt = d
    return bt


def regnet_se_forward(x, w1, b1, w2, b2):
    """x: (N, C, H, W).  w1: (S, C), b1: (S,), w2: (C, S), b2: (C,)."""
    N, C, H, W = x.shape
    S = w1.shape[0]
    HW = H * W

    # Lane-dense spatial axis: pad HW up to a multiple of 128 (unmasked stores).
    HW_pad = ((HW + 127) // 128) * 128
    x2 = x.reshape(N, C, HW)
    if HW_pad != HW:
        x2 = jnp.pad(x2, ((0, 0), (0, 0), (0, HW_pad - HW)))

    # Pre-transpose weights so the in-kernel FCs are plain (BT,C)@(C,S) / (BT,S)@(S,C).
    w1t = w1.T                      # (C, S)
    w2t = w2.T                      # (S, C)
    b1r = b1.reshape(1, S)
    b2r = b2.reshape(1, C)

    # Size the batch tile against a conservative VMEM budget (v7x has 64 MiB
    # physical / 32 MiB default-scoped per TC; v5e/v6e have 128 MiB physical).
    vmem_limit = 64 * 1024 * 1024
    block_budget = 16 * 1024 * 1024          # leaves plenty of headroom under the limit
    per_elem_bytes = C * HW_pad * x2.dtype.itemsize
    B_TILE = _pick_batch_tile(N, per_elem_bytes, block_budget)

    kernel = functools.partial(_se_kernel, inv_hw=1.0 / float(HW))

    out = pl.pallas_call(
        kernel,
        out_shape=jax.ShapeDtypeStruct((N, C, HW_pad), x.dtype),
        grid_spec=pltpu.PrefetchScalarGridSpec(
            num_scalar_prefetch=0,
            grid=(N // B_TILE,),
            in_specs=[
                pl.BlockSpec((B_TILE, C, HW_pad), lambda n: (n, 0, 0)),  # x slab
                pl.BlockSpec((C, S), lambda n: (0, 0)),                  # w1^T (resident)
                pl.BlockSpec((1, S), lambda n: (0, 0)),                  # b1
                pl.BlockSpec((S, C), lambda n: (0, 0)),                  # w2^T (resident)
                pl.BlockSpec((1, C), lambda n: (0, 0)),                  # b2
            ],
            out_specs=pl.BlockSpec((B_TILE, C, HW_pad), lambda n: (n, 0, 0)),
        ),
        compiler_params=pltpu.CompilerParams(
            dimension_semantics=("parallel",),   # lets v7x shard the batch grid over both TCs
            vmem_limit_bytes=vmem_limit,
        ),
    )(x2, w1t, b1r, w2t, b2r)

    if HW_pad != HW:
        out = out[:, :, :HW]
    return out.reshape(N, C, H, W)


def regnet_se_reference(x, w1, b1, w2, b2):
    pooled = jnp.mean(x, axis=(2, 3))                              # (N, C)
    h = jnp.maximum(pooled @ w1.T + b1, 0.0)                       # (N, S)
    s = jax.nn.sigmoid(h @ w2.T + b2)                              # (N, C)
    return x * s[:, :, None, None]


if __name__ == "__main__":
    # RegNetSE(in_planes=4, se_planes=2) at small shapes
    N, C, H, W = 2, 4, 16, 16
    S = 2

    key = jax.random.PRNGKey(0)
    kx, kw1, kb1, kw2, kb2 = jax.random.split(key, 5)
    x = jax.random.normal(kx, (N, C, H, W), dtype=jnp.float32)
    w1 = jax.random.normal(kw1, (S, C), dtype=jnp.float32) * 0.1   # se1.weight (S,C,1,1) squeezed
    b1 = jax.random.normal(kb1, (S,), dtype=jnp.float32) * 0.1     # se1.bias
    w2 = jax.random.normal(kw2, (C, S), dtype=jnp.float32) * 0.1   # se2.weight (C,S,1,1) squeezed
    b2 = jax.random.normal(kb2, (C,), dtype=jnp.float32) * 0.1     # se2.bias

    out = regnet_se_forward(x, w1, b1, w2, b2)
    out = jax.block_until_ready(out)

    ref = regnet_se_reference(x, w1, b1, w2, b2)
    assert out.shape == (N, C, H, W)
    assert jnp.allclose(out, ref, atol=1e-5, rtol=1e-5)

    print("KERNEL_OK")
</pallas_src>

<mosaic_0001>
module attributes {stable_mosaic.version = 11 : i64} {
  func.func @_se_kernel(%arg0: i32, %arg1: memref<2x4x256xf32, #tpu.memory_space<vmem>>, %arg2: memref<4x2xf32, #tpu.memory_space<vmem>>, %arg3: memref<1x2xf32, #tpu.memory_space<vmem>>, %arg4: memref<2x4xf32, #tpu.memory_space<vmem>>, %arg5: memref<1x4xf32, #tpu.memory_space<vmem>>, %arg6: memref<2x4x256xf32, #tpu.memory_space<vmem>>) attributes {dimension_semantics = [#tpu.dimension_semantics<parallel>], iteration_bounds = array<i64: 1>, scalar_prefetch = 0 : i64, scratch_operands = 0 : i64, tpu.core_type = #tpu.core_type<tc>, window_params = [{transform_indices = @transform_0, window_bounds = array<i64: 2, 4, 256>}, {pipeline_mode = #tpu.pipeline_mode<synchronous>, transform_indices = @transform_1, window_bounds = array<i64: 4, 2>}, {pipeline_mode = #tpu.pipeline_mode<synchronous>, transform_indices = @transform_2, window_bounds = array<i64: 1, 2>}, {pipeline_mode = #tpu.pipeline_mode<synchronous>, transform_indices = @transform_3, window_bounds = array<i64: 2, 4>}, {pipeline_mode = #tpu.pipeline_mode<synchronous>, transform_indices = @transform_4, window_bounds = array<i64: 1, 4>}, {transform_indices = @transform_5, window_bounds = array<i64: 2, 4, 256>}]} {
    %c0 = arith.constant 0 : index
    %c0_0 = arith.constant 0 : index
    %c0_1 = arith.constant 0 : index
    %0 = vector.load %arg1[%c0, %c0_0, %c0_1] : memref<2x4x256xf32, #tpu.memory_space<vmem>>, vector<2x4x256xf32>
    %cst = arith.constant dense<0.000000e+00> : vector<2x4xf32>
    %1 = vector.multi_reduction <add>, %0, %cst [2] : vector<2x4x256xf32> to vector<2x4xf32>
    %cst_2 = arith.constant 3.906250e-03 : f32
    %2 = vector.broadcast %cst_2 : f32 to vector<2x4xf32>
    %3 = arith.mulf %1, %2 : vector<2x4xf32>
    %c0_3 = arith.constant 0 : index
    %c0_4 = arith.constant 0 : index
    %4 = vector.load %arg2[%c0_3, %c0_4] : memref<4x2xf32, #tpu.memory_space<vmem>>, vector<4x2xf32>
    %cst_5 = arith.constant dense<0.000000e+00> : vector<2x2xf32>
    %5 = tpu.matmul %3, %4, %cst_5 {dimension_numbers = #tpu.dot_dimension_numbers<[1], [0], [0], [1], [0, 0, 1, 1], [], []>} : vector<2x4xf32>, vector<4x2xf32>, vector<2x2xf32> -> vector<2x2xf32>
    %c0_6 = arith.constant 0 : index
    %c0_7 = arith.constant 0 : index
    %6 = vector.load %arg3[%c0_6, %c0_7] : memref<1x2xf32, #tpu.memory_space<vmem>>, vector<1x2xf32>
    %7 = vector.broadcast %6 : vector<1x2xf32> to vector<2x2xf32>
    %8 = arith.addf %5, %7 : vector<2x2xf32>
    %cst_8 = arith.constant 0.000000e+00 : f32
    %9 = vector.broadcast %cst_8 : f32 to vector<2x2xf32>
    %10 = arith.maximumf %8, %9 : vector<2x2xf32>
    %c0_9 = arith.constant 0 : index
    %c0_10 = arith.constant 0 : index
    %11 = vector.load %arg4[%c0_9, %c0_10] : memref<2x4xf32, #tpu.memory_space<vmem>>, vector<2x4xf32>
    %cst_11 = arith.constant dense<0.000000e+00> : vector<2x4xf32>
    %12 = tpu.matmul %10, %11, %cst_11 {dimension_numbers = #tpu.dot_dimension_numbers<[1], [0], [0], [1], [0, 0, 1, 1], [], []>} : vector<2x2xf32>, vector<2x4xf32>, vector<2x4xf32> -> vector<2x4xf32>
    %c0_12 = arith.constant 0 : index
    %c0_13 = arith.constant 0 : index
    %13 = vector.load %arg5[%c0_12, %c0_13] : memref<1x4xf32, #tpu.memory_space<vmem>>, vector<1x4xf32>
    %14 = vector.broadcast %13 : vector<1x4xf32> to vector<2x4xf32>
    %15 = arith.addf %12, %14 : vector<2x4xf32>
    %16 = arith.negf %15 : vector<2x4xf32>
    %17 = math.exp %16 : vector<2x4xf32>
    %cst_14 = arith.constant 1.000000e+00 : f32
    %18 = vector.broadcast %cst_14 : f32 to vector<2x4xf32>
    %19 = arith.addf %18, %17 : vector<2x4xf32>
    %20 = arith.divf %18, %19 : vector<2x4xf32>
    %21 = vector.shape_cast %20 : vector<2x4xf32> to vector<2x4x1xf32>
    %22 = vector.broadcast %21 : vector<2x4x1xf32> to vector<2x4x256xf32>
    %23 = arith.mulf %0, %22 : vector<2x4x256xf32>
    %c0_15 = arith.constant 0 : index
    %c0_16 = arith.constant 0 : index
    %c0_17 = arith.constant 0 : index
    %24 = vector.load %arg6[%c0_15, %c0_16, %c0_17] : memref<2x4x256xf32, #tpu.memory_space<vmem>>, vector<2x4x256xf32>
    tpu.vector_store %arg6[%c0_15, %c0_16, %c0_17], %23 {strides = array<i32>} : memref<2x4x256xf32, #tpu.memory_space<vmem>>, vector<2x4x256xf32>,
    return
  }
  func.func @transform_0(%arg0: i32) -> (i32, i32, i32) {
    %c0_i32 = arith.constant 0 : i32
    %c0_i32_0 = arith.constant 0 : i32
    %c0_i32_1 = arith.constant 0 : i32
    return %arg0, %c0_i32, %c0_i32_0 : i32, i32, i32
  }
  func.func @transform_1(%arg0: i32) -> (i32, i32) {
    %c0_i32 = arith.constant 0 : i32
    %c0_i32_0 = arith.constant 0 : i32
    %c0_i32_1 = arith.constant 0 : i32
    return %c0_i32, %c0_i32_0 : i32, i32
  }
  func.func @transform_2(%arg0: i32) -> (i32, i32) {
    %c0_i32 = arith.constant 0 : i32
    %c0_i32_0 = arith.constant 0 : i32
    %c0_i32_1 = arith.constant 0 : i32
    return %c0_i32, %c0_i32_0 : i32, i32
  }
  func.func @transform_3(%arg0: i32) -> (i32, i32) {
    %c0_i32 = arith.constant 0 : i32
    %c0_i32_0 = arith.constant 0 : i32
    %c0_i32_1 = arith.constant 0 : i32
    return %c0_i32, %c0_i32_0 : i32, i32
  }
  func.func @transform_4(%arg0: i32) -> (i32, i32) {
    %c0_i32 = arith.constant 0 : i32
    %c0_i32_0 = arith.constant 0 : i32
    %c0_i32_1 = arith.constant 0 : i32
    return %c0_i32, %c0_i32_0 : i32, i32
  }
  func.func @transform_5(%arg0: i32) -> (i32, i32, i32) {
    %c0_i32 = arith.constant 0 : i32
    %c0_i32_0 = arith.constant 0 : i32
    %c0_i32_1 = arith.constant 0 : i32
    return %arg0, %c0_i32, %c0_i32_0 : i32, i32, i32
  }
}

</mosaic_0001>

<bundles_post_ra>
// kernel: tpu_custom_call.1
= control target key start
LH: loop header
LB: loop body
LE: loop exit
PB: predicated region body
PF: predicated region fallthrough
CT: control target
= control target key end

     0   :  { %10 = vsyncpa [#allocation3], 0  ;;  %s456_s0 = inlined_call_operand.hbm [shape: f32[2,4,256], index: 0, kind: input, shape index: {}]   ;;  %s457_s1 = inlined_call_operand.vmem [shape: f32[4,2], index: 1, kind: input, shape index: {}]   ;;  %s458_s2 = inlined_call_operand.vmem [shape: f32[1,2], index: 2, kind: input, shape index: {}]   ;;  %s459_s3 = inlined_call_operand.vmem [shape: f32[2,4], index: 3, kind: input, shape index: {}]   ;;  %s460_s4 = inlined_call_operand.vmem [shape: f32[1,4], index: 4, kind: input, shape index: {}]   ;;  %s461_s5 = inlined_call_operand.hbm [shape: f32[2,4,256], index: 5, kind: output, shape index: {}]  }
   0x1   :  { %11 = vsyncpa [#allocation4], 0  ;;  %s378_s18 = smov [#allocation2]  }
   0x2   :  { %s17_s19 = sshll.u32 %s378_s18, 4  ;;  %s18_s19 = int_to_ptr.vmem [resolvable:$true] %s17_s19 }
   0x3   :  { %s342_s20 = scalar_lea.vmem %s18_s19, 256  ;;  %p347_p1 = scmp.lt.s32.totalorder %s18_s19, %s18_s19 }
   0x4   :  { %p343_p0 = scmp.ne.s32.totalorder %s18_s19, %s342_s20  ;;  %p348_p2 = scmp.lt.s32.totalorder %s342_s20, %s342_s20 }
   0x6   :  { %p349_p3 = por %p348_p2, %p347_p1 }
   0x8   :  { %p350_p4 = pnand %p349_p3, %p343_p0 }
   0xa   :  { %353 = shalt.err (!%p350_p4)
}
   0xb   :  { %s379_s21 = smov 128   ;;  %s380_s22 = smov 8  }
   0xc   :  { %23 = dma.hbm_to_vmem [thread:$0]  %s456_s0, 256, %s18_s19, [#allocation3], %s379_s21, %s379_s21, %s380_s22  }
   0xd   :  { %374 = dma.done.wait [#allocation3], 256  }
   0xe   :  { %375 = vsyncadd [#allocation3], 4294967040  ;;  %vm43_vm0 = vcmask 1043456   ;;  %v421_v0 = vld [vmem:[#allocation2] sm:$0xff]  ;;  %v423_v1 = vld [vmem:[#allocation2 + $0x8] sm:$0xff]  ;;  %v381_v11 = vmov 0.0   ;;  %v66_v12 = vlaneseq }
   0xf   :  { %v39_v2 = vcombine.high %v421_v0, %v421_v0  ;;  %v44_v3 = vsel %vm43_vm0, %v421_v0, 0.0  ;;  %v40_v4 = vcombine.high %v423_v1, %v423_v1  ;;  %v49_v6 = vsel %vm43_vm0, %v423_v1, 0.0  ;;  %v56_v10 = vld [vmem:[%s457_s1] sm:$0xf]  ;;  %311 = vmatprep.subr.mxu0 %v381_v11  ;;  %316 = vmatprep.subr.mxu1 %v381_v11 }
  0x10   :  { %vm382_vm1 = vmmov 0   ;;  %312 = vmatpush3.msk.msra.mxu0 %vm43_vm0, %v56_v10  ;;  %v67_v13 = vand.u32 127, %v66_v12  ;;  %v69_v14 = vshrl.u32 %v66_v12, 7  ;;  %vm76_vm2 = vcmask 1041409   ;;  %v155_v23 = vld [vmem:[%s459_s3] sm:$0x3] }
  0x11   :  { %v45_v5 = vsel %vm43_vm0, %v39_v2, 0.0  ;;  %v50_v7 = vsel %vm43_vm0, %v40_v4, 0.0  ;;  %313 = vmatprep.mubr.msk.f32.mxu0 %vm382_vm1, %v381_v11  ;;  %318 = vmatprep.mubr.msk.f32.mxu1 %vm382_vm1, %v381_v11  ;;  %vm78_vm3 = vcmask 31744   ;;  %vm167_vm4 = vcmask 1041408   ;;  %v300_v24 = vld [vmem:[%s458_s2] ss:$0 sm:$0xff] }
  0x12   :  { %v46_v8 = vadd.f32 %v45_v5, %v44_v3  ;;  %v51_v9 = vadd.f32 %v50_v7, %v49_v6  ;;  %v70_v16 = vsub.s32 %v67_v13, %v69_v14  ;;  %317 = vmatpush3.msk.msra.mxu1 %vm167_vm4, %v155_v23  ;;  %vm163_vm5 = vcmask 15360   ;;  %v303_v29 = vld [vmem:[%s460_s4] ss:$0 sm:$0xff]  ;;  %s384_s2 = smov [#allocation5]  }
  0x13   :  { %v249_v36 = vsub.s32 0, %v69_v14  ;;  %v256_v39 = vsub.s32 1, %v69_v14  ;;  %v383_v41 = vmov 839922192   ;;  %s288_s3 = sshll.u32 %s384_s2, 4  ;;  %s289_s3 = int_to_ptr.vmem [resolvable:$true] %s288_s3 }
  0x14   :  { %47 = vadd.xlane.f32.xlu0 %v46_v8  ;;  %v264_v42 = vunpack.c.l.s4 %v383_v41  ;;  %s354_s4 = scalar_lea.vmem %s289_s3, 256  ;;  %p359_p6 = scmp.lt.s32.totalorder %s289_s3, %s289_s3 }
  0x15   :  { %p355_p5 = scmp.ne.s32.totalorder %s289_s3, %s354_s4  ;;  %p360_p7 = scmp.lt.s32.totalorder %s354_s4, %s354_s4 }
  0x16   :  { %v265_v43 = vunpack.c.0.s8 %v264_v42 }
  0x17   :  { %p361_p8 = por %p360_p7, %p359_p6 }
  0x18   :  { %52 = vadd.xlane.f32.xlu0 %v51_v9  ;;  %v268_v44 = vsub.s32 %v265_v43, %v69_v14 }
  0x19   :  { %p362_p9 = pnand %p361_p8, %p355_p5 }
  0x9d   :  { %v48_v15 = vpop.xlane.xlu0 %47 }
  0x9e   :  { %v54_v17 = vmul.f32 0.00390625, %v48_v15 }
  0xa0   :  { %v71_v20 = vrot.slane %v54_v17, %v70_v16 }
  0xa1   :  { %v53_v18 = vpop.xlane.xlu0 %52 }
  0xa2   :  { %v55_v19 = vmul.f32 0.00390625, %v53_v18 }
  0xa4   :  { %v75_v21 = vrot.slane %v55_v19, %v70_v16 }
  0xa6   :  { %v77_v22 = vsel %vm76_vm2, %v75_v21, %v71_v20 }
  0xa7   :  { %314 = vmatmul.mubr.msk.f32.vlgmr.msra.gmra.mxu0 %vm78_vm3, %v77_v22 }
 0x167   :  { %v150_v25 = vpop.f32.mrf.mxu0 }
 0x168   :  { %v151_v26 = vadd.f32 %v300_v24, %v150_v25 }
 0x169   :  { %v315_v27 = vpop.f32.mrf.mxu0 }
 0x16a   :  { %v154_v28 = vmax.f32 %v151_v26, 0.0 }
 0x16c   :  { %319 = vmatmul.mubr.msk.f32.vlgmr.msra.gmra.mxu1 %vm163_vm5, %v154_v28 }
 0x22c   :  { %v237_v30 = vpop.f32.mrf.mxu1 }
 0x22d   :  { %v238_v31 = vadd.f32 %v303_v29, %v237_v30 }
 0x22e   :  { %v320_v32 = vpop.f32.mrf.mxu1 }
 0x22f   :  { %v306_v33 = vmul.f32 -1.442695, %v238_v31 }
 0x231   :  { %330 = vpow2.f32 %v306_v33 }
 0x23e   :  { %v331_v34 = vpop.eup %330 }
 0x23f   :  { %v244_v35 = vadd.f32 1.0, %v331_v34 }
 0x241   :  { %332 = vrcp.f32 %v244_v35 }
 0x24e   :  { %v333_v37 = vpop.eup %332 }
 0x24f   :  { %v250_v38 = vrot.slane %v333_v37, %v249_v36  ;;  %v257_v40 = vrot.slane %v333_v37, %v256_v39 }
 0x251   :  { %252 = vbcast.lane.b32.xlu1 %v250_v38, 256 }
 0x255   :  { %259 = vbcast.lane.b32.xlu1 %v257_v40, 256 }
 0x2c3   :  { %v253_v45 = vpop.permute.xlu1 %252 }
 0x2c4   :  { %v269_v46 = vrot.slane %v253_v45, %v268_v44 }
 0x2c6   :  { %v279_v47 = vmul.f32 %v269_v46, %v421_v0 }
 0x2c7   :  { %v260_v48 = vpop.permute.xlu1 %259 }
 0x2c8   :  { %281 = vst [vmem:[#allocation5] sm:$0xff] %v279_v47  ;;  %v276_v49 = vrot.slane %v260_v48, %v268_v44 }
 0x2ca   :  { %v280_v50 = vmul.f32 %v276_v49, %v423_v1 }
 0x2cc   :  { %282 = vst [vmem:[#allocation5 + $0x8] sm:$0xff] %v280_v50 }
 0x2cd   :  { %365 = shalt.err (!%p362_p9)
}
 0x2ce   :  { %294 = dma.vmem_to_hbm [thread:$0]  %s289_s3, 256, %s461_s5, [#allocation4], %s379_s21, %s379_s21, %s380_s22  }
 0x2cf   :  { %376 = dma.done.wait [#allocation4], 256  }
 0x2d0   :  { %377 = vsyncadd [#allocation4], 4294967040 }
 0x2d1   :  { %298 = vsyncpa [#allocation3], 1 }
 0x2d2   :  { %299 = vsyncpa [#allocation4], 1 }

</bundles_post_ra>
